<compile_context>
chip_gen: v7x
topology: tpu7x:2x2x1
jax: 0.10.0
libtpu: 0.0.40
codegen_flags: <defaults>
</compile_context>

<pallas_src>
import functools
import math

import jax
import jax.numpy as jnp
from jax.experimental import pallas as pl
from jax.experimental.pallas import tpu as pltpu


def _round_up(x, m):
    return ((x + m - 1) // m) * m


def _encoder_kernel(x0_ref, adj_ref, w_ref, b_ref, o_ref, x_cur, support, *, tm):
    """Fused k-layer GCN. Grid = (layer, row_tile).

    x0_ref : (Np, Fp)    bf16, padded input features (resident: constant index_map)
    adj_ref: (tm, Np)    bf16, row tile of padded adjacency (pipelined)
    w_ref  : (1, Fp, Fp) bf16, this layer's padded weight (pipelined over layers)
    b_ref  : (1, 1, Fp)  f32,  this layer's padded bias
    o_ref  : (tm, Fp)    f32,  output row tile (written only on the last layer)
    x_cur  : (Np, Fp)    bf16 VMEM scratch, current layer's input activation
    support: (Np, Fp)    bf16 VMEM scratch, x_cur @ W for the current layer
    """
    layer = pl.program_id(0)
    i = pl.program_id(1)
    last_layer = pl.num_programs(0) - 1

    # Layer 0, first row tile: bring the padded input into the resident buffer.
    @pl.when((layer == 0) & (i == 0))
    def _():
        x_cur[...] = x0_ref[...]

    # Once per layer: support = x_cur @ W[layer]  (full Np x Fp, stays resident,
    # reused by every output row tile of this layer).
    @pl.when(i == 0)
    def _():
        support[...] = jnp.dot(
            x_cur[...], w_ref[0], preferred_element_type=jnp.float32
        ).astype(support.dtype)

    # Row tile: out = adj[i*tm:(i+1)*tm, :] @ support, then f32 bias + ReLU epilogue.
    out = jnp.dot(adj_ref[...], support[...], preferred_element_type=jnp.float32)
    out = jnp.maximum(out + b_ref[0], 0.0)

    # Intermediate layers: feed the next layer (bf16, MXU-ready).  Safe to
    # overwrite x_cur rows here because `support` already snapshotted this
    # layer's input at i == 0.
    @pl.when(layer < last_layer)
    def _():
        row = pl.multiple_of(i * tm, tm)
        x_cur[pl.ds(row, tm), :] = out.astype(x_cur.dtype)

    # Final layer: emit this row tile to HBM (the only write that must land;
    # earlier visits to this output block are overwritten by this one).
    @pl.when(layer == last_layer)
    def _():
        o_ref[...] = out.astype(o_ref.dtype)


def encoder_forward(x, adj, params, *, tm=128):
    """Run the fused k-layer GCN encoder. x: [N, F_in] f32, adj: [N, N] f32 (dense)."""
    n, f_in = x.shape
    k = len(params)
    f_dims = [f_in] + [w.shape[1] for (w, _) in params]
    f_out = f_dims[-1]

    fp = _round_up(max(f_dims), 128)          # lane-dense feature width
    np_ = _round_up(max(n, tm), tm)           # row count, multiple of tm
    r = np_ // tm

    # Zero-padded, bf16 MXU operands (f32 bias).
    x_p = jnp.zeros((np_, fp), jnp.bfloat16).at[:n, :f_in].set(x.astype(jnp.bfloat16))
    adj_p = jnp.zeros((np_, np_), jnp.bfloat16).at[:n, :n].set(adj.astype(jnp.bfloat16))
    w_p = jnp.zeros((k, fp, fp), jnp.bfloat16)
    b_p = jnp.zeros((k, 1, fp), jnp.float32)
    for l, (w, b) in enumerate(params):
        w_p = w_p.at[l, : w.shape[0], : w.shape[1]].set(w.astype(jnp.bfloat16))
        b_p = b_p.at[l, 0, : b.shape[0]].set(b.astype(jnp.float32))

    out_p = pl.pallas_call(
        functools.partial(_encoder_kernel, tm=tm),
        out_shape=jax.ShapeDtypeStruct((np_, fp), jnp.float32),
        grid_spec=pltpu.PrefetchScalarGridSpec(
            num_scalar_prefetch=0,
            grid=(k, r),  # (layer, row_tile); layer outermost
            in_specs=[
                # padded input features: constant block index -> DMA'd once, resident
                pl.BlockSpec((np_, fp), lambda l, i: (0, 0)),
                # adjacency row tile (full column extent), pipelined per row tile
                pl.BlockSpec((tm, np_), lambda l, i: (i, 0)),
                # this layer's weight / bias, pipelined along the layer axis
                pl.BlockSpec((1, fp, fp), lambda l, i: (l, 0, 0)),
                pl.BlockSpec((1, 1, fp), lambda l, i: (l, 0, 0)),
            ],
            out_specs=pl.BlockSpec((tm, fp), lambda l, i: (i, 0)),
            scratch_shapes=[
                pltpu.VMEM((np_, fp), jnp.bfloat16),  # x_cur   (inter-layer activation)
                pltpu.VMEM((np_, fp), jnp.bfloat16),  # support (x_cur @ W, per layer)
            ],
        ),
        compiler_params=pltpu.CompilerParams(
            # Row tiles of layer l+1 depend on all row tiles of layer l via the
            # resident scratch, so neither axis can be megacore-"parallel".
            dimension_semantics=("arbitrary", "arbitrary"),
        ),
    )(x_p, adj_p, w_p, b_p)

    return out_p[:n, :f_out]


def kaiming_uniform(key, shape):
    # mirrors torch.nn.init.kaiming_uniform_ defaults (test-data init only)
    fan_in = shape[0]
    bound = math.sqrt(2.0) * math.sqrt(3.0 / fan_in)
    return jax.random.uniform(key, shape, jnp.float32, minval=-bound, maxval=bound)


def init_encoder_params(key, in_channels, out_channels, k=2):
    """Parameter init mirroring Encoder.__init__ (GCN base model)."""
    dims = [in_channels] + [2 * out_channels] * (k - 1) + [out_channels]
    params = []
    for i in range(k):
        key, sub = jax.random.split(key)
        w = kaiming_uniform(sub, (dims[i], dims[i + 1]))
        b = jnp.zeros((dims[i + 1],), jnp.float32)
        params.append((w, b))
    return params


def encoder_reference(x, adj, params):
    """Pure-JAX reference mirroring the kernel's bf16 operand / f32 accumulate path."""
    f32 = jnp.float32
    bf = lambda a: a.astype(jnp.bfloat16).astype(f32)
    xb = bf(x)
    ab = bf(adj)
    y = xb
    for (w, b) in params:
        s = bf(xb @ bf(w))                      # support stored bf16 in the kernel
        y = jnp.maximum(ab @ s + b, 0.0)        # f32 epilogue
        xb = bf(y)                              # next layer input stored bf16
    return y


if __name__ == "__main__":
    key = jax.random.PRNGKey(0)
    N = 256             # number of graph nodes
    in_channels = 48    # deliberately not a multiple of 128 (exercises padding)
    out_channels = 32

    k_x, k_adj, k_p = jax.random.split(key, 3)
    x = jax.random.normal(k_x, (N, in_channels), jnp.float32)

    # symmetric row-normalized dense adjacency (stand-in for the sparse adj)
    a = (jax.random.uniform(k_adj, (N, N)) < 0.2).astype(jnp.float32)
    a = jnp.maximum(a, a.T) + jnp.eye(N, dtype=jnp.float32)
    adj = a / jnp.sum(a, axis=1, keepdims=True)

    ok = True
    for k_layers in (2, 3):   # k=2 (module default) and k=3 (exercises middle layer)
        params = init_encoder_params(k_p, in_channels, out_channels, k=k_layers)
        out = encoder_forward(x, adj, params)
        out = jax.block_until_ready(out)
        ref = encoder_reference(x, adj, params)
        assert out.shape == (N, out_channels)
        err = float(jnp.max(jnp.abs(out - ref)))
        ok = ok and bool(jnp.allclose(out, ref, atol=1e-2, rtol=1e-2))
        assert ok, (k_layers, err)

    print("KERNEL_OK")
</pallas_src>

<mosaic_0001>
module attributes {stable_mosaic.version = 11 : i64} {
  func.func @_encoder_kernel(%arg0: i32, %arg1: i32, %arg2: memref<256x128xbf16, #tpu.memory_space<vmem>>, %arg3: memref<128x256xbf16, #tpu.memory_space<vmem>>, %arg4: memref<1x128x128xbf16, #tpu.memory_space<vmem>>, %arg5: memref<1x1x128xf32, #tpu.memory_space<vmem>>, %arg6: memref<128x128xf32, #tpu.memory_space<vmem>>, %arg7: memref<256x128xbf16, #tpu.memory_space<vmem>>, %arg8: memref<256x128xbf16, #tpu.memory_space<vmem>>) attributes {dimension_semantics = [#tpu.dimension_semantics<arbitrary>, #tpu.dimension_semantics<arbitrary>], iteration_bounds = array<i64: 2, 2>, scalar_prefetch = 0 : i64, scratch_operands = 2 : i64, tpu.core_type = #tpu.core_type<tc>, window_params = [{pipeline_mode = #tpu.pipeline_mode<synchronous>, transform_indices = @transform_0, window_bounds = array<i64: 256, 128>}, {transform_indices = @transform_1, window_bounds = array<i64: 128, 256>}, {transform_indices = @transform_2, window_bounds = array<i64: 1, 128, 128>}, {transform_indices = @transform_3, window_bounds = array<i64: 1, 1, 128>}, {transform_indices = @transform_4, window_bounds = array<i64: 128, 128>}]} {
    %c0_i32 = arith.constant 0 : i32
    %0 = arith.cmpi eq, %arg0, %c0_i32 : i32
    %c0_i32_0 = arith.constant 0 : i32
    %1 = arith.cmpi eq, %arg1, %c0_i32_0 : i32
    %2 = arith.andi %0, %1 : i1
    %3 = arith.extui %2 : i1 to i32
    %c0_i32_1 = arith.constant 0 : i32
    %4 = arith.cmpi ne, %3, %c0_i32_1 : i32
    scf.if %4 {
      %c0_14 = arith.constant 0 : index
      %c0_15 = arith.constant 0 : index
      %23 = vector.load %arg2[%c0_14, %c0_15] : memref<256x128xbf16, #tpu.memory_space<vmem>>, vector<256x128xbf16>
      %c0_16 = arith.constant 0 : index
      %c0_17 = arith.constant 0 : index
      %24 = vector.load %arg7[%c0_16, %c0_17] : memref<256x128xbf16, #tpu.memory_space<vmem>>, vector<256x128xbf16>
      tpu.vector_store %arg7[%c0_16, %c0_17], %23 {strides = array<i32>} : memref<256x128xbf16, #tpu.memory_space<vmem>>, vector<256x128xbf16>,
    } else {
    }
    %c0_i32_2 = arith.constant 0 : i32
    %5 = arith.cmpi eq, %arg1, %c0_i32_2 : i32
    %6 = arith.extui %5 : i1 to i32
    %c0_i32_3 = arith.constant 0 : i32
    %7 = arith.cmpi ne, %6, %c0_i32_3 : i32
    scf.if %7 {
      %c0_14 = arith.constant 0 : index
      %c0_15 = arith.constant 0 : index
      %23 = vector.load %arg7[%c0_14, %c0_15] : memref<256x128xbf16, #tpu.memory_space<vmem>>, vector<256x128xbf16>
      %c0_16 = arith.constant 0 : index
      %c0_17 = arith.constant 0 : index
      %c0_18 = arith.constant 0 : index
      %24 = vector.load %arg4[%c0_16, %c0_17, %c0_18] : memref<1x128x128xbf16, #tpu.memory_space<vmem>>, vector<1x128x128xbf16>
      %25 = vector.shape_cast %24 : vector<1x128x128xbf16> to vector<128x128xbf16>
      %cst_19 = arith.constant dense<0.000000e+00> : vector<256x128xf32>
      %26 = tpu.matmul %23, %25, %cst_19 {dimension_numbers = #tpu.dot_dimension_numbers<[1], [0], [0], [1], [0, 0, 1, 1], [], []>} : vector<256x128xbf16>, vector<128x128xbf16>, vector<256x128xf32> -> vector<256x128xf32>
      %27 = arith.truncf %26 : vector<256x128xf32> to vector<256x128xbf16>
      %c0_20 = arith.constant 0 : index
      %c0_21 = arith.constant 0 : index
      %28 = vector.load %arg8[%c0_20, %c0_21] : memref<256x128xbf16, #tpu.memory_space<vmem>>, vector<256x128xbf16>
      tpu.vector_store %arg8[%c0_20, %c0_21], %27 {strides = array<i32>} : memref<256x128xbf16, #tpu.memory_space<vmem>>, vector<256x128xbf16>,
    } else {
    }
    %c0 = arith.constant 0 : index
    %c0_4 = arith.constant 0 : index
    %8 = vector.load %arg3[%c0, %c0_4] : memref<128x256xbf16, #tpu.memory_space<vmem>>, vector<128x256xbf16>
    %c0_5 = arith.constant 0 : index
    %c0_6 = arith.constant 0 : index
    %9 = vector.load %arg8[%c0_5, %c0_6] : memref<256x128xbf16, #tpu.memory_space<vmem>>, vector<256x128xbf16>
    %cst = arith.constant dense<0.000000e+00> : vector<128x128xf32>
    %10 = tpu.matmul %8, %9, %cst {dimension_numbers = #tpu.dot_dimension_numbers<[1], [0], [0], [1], [0, 0, 1, 1], [], []>} : vector<128x256xbf16>, vector<256x128xbf16>, vector<128x128xf32> -> vector<128x128xf32>
    %c0_7 = arith.constant 0 : index
    %c0_8 = arith.constant 0 : index
    %c0_9 = arith.constant 0 : index
    %11 = vector.load %arg5[%c0_7, %c0_8, %c0_9] : memref<1x1x128xf32, #tpu.memory_space<vmem>>, vector<1x1x128xf32>
    %12 = vector.shape_cast %11 : vector<1x1x128xf32> to vector<1x128xf32>
    %13 = vector.broadcast %12 : vector<1x128xf32> to vector<128x128xf32>
    %14 = arith.addf %10, %13 : vector<128x128xf32>
    %cst_10 = arith.constant 0.000000e+00 : f32
    %15 = vector.broadcast %cst_10 : f32 to vector<128x128xf32>
    %16 = arith.maximumf %14, %15 : vector<128x128xf32>
    %c1_i32 = arith.constant 1 : i32
    %17 = arith.cmpi slt, %arg0, %c1_i32 : i32
    %18 = arith.extui %17 : i1 to i32
    %c0_i32_11 = arith.constant 0 : i32
    %19 = arith.cmpi ne, %18, %c0_i32_11 : i32
    scf.if %19 {
      %c128_i32 = arith.constant 128 : i32
      %23 = arith.muli %arg1, %c128_i32 : i32
      %24 = tpu.assume_multiple %23, 128 : i32
      %25 = arith.truncf %16 : vector<128x128xf32> to vector<128x128xbf16>
      %26 = arith.index_cast %24 : i32 to index
      %c0_14 = arith.constant 0 : index
      %27 = vector.load %arg7[%26, %c0_14] : memref<256x128xbf16, #tpu.memory_space<vmem>>, vector<128x128xbf16>
      tpu.vector_store %arg7[%26, %c0_14], %25 {strides = array<i32>} : memref<256x128xbf16, #tpu.memory_space<vmem>>, vector<128x128xbf16>,
    } else {
    }
    %c1_i32_12 = arith.constant 1 : i32
    %20 = arith.cmpi eq, %arg0, %c1_i32_12 : i32
    %21 = arith.extui %20 : i1 to i32
    %c0_i32_13 = arith.constant 0 : i32
    %22 = arith.cmpi ne, %21, %c0_i32_13 : i32
    scf.if %22 {
      %c0_14 = arith.constant 0 : index
      %c0_15 = arith.constant 0 : index
      %23 = vector.load %arg6[%c0_14, %c0_15] : memref<128x128xf32, #tpu.memory_space<vmem>>, vector<128x128xf32>
      tpu.vector_store %arg6[%c0_14, %c0_15], %16 {strides = array<i32>} : memref<128x128xf32, #tpu.memory_space<vmem>>, vector<128x128xf32>,
    } else {
    }
    return
  }
  func.func @transform_0(%arg0: i32, %arg1: i32) -> (i32, i32) {
    %c0_i32 = arith.constant 0 : i32
    %c0_i32_0 = arith.constant 0 : i32
    %c0_i32_1 = arith.constant 0 : i32
    return %c0_i32, %c0_i32_0 : i32, i32
  }
  func.func @transform_1(%arg0: i32, %arg1: i32) -> (i32, i32) {
    %c0_i32 = arith.constant 0 : i32
    %c0_i32_0 = arith.constant 0 : i32
    return %arg1, %c0_i32 : i32, i32
  }
  func.func @transform_2(%arg0: i32, %arg1: i32) -> (i32, i32, i32) {
    %c0_i32 = arith.constant 0 : i32
    %c0_i32_0 = arith.constant 0 : i32
    %c0_i32_1 = arith.constant 0 : i32
    return %arg0, %c0_i32, %c0_i32_0 : i32, i32, i32
  }
  func.func @transform_3(%arg0: i32, %arg1: i32) -> (i32, i32, i32) {
    %c0_i32 = arith.constant 0 : i32
    %c0_i32_0 = arith.constant 0 : i32
    %c0_i32_1 = arith.constant 0 : i32
    return %arg0, %c0_i32, %c0_i32_0 : i32, i32, i32
  }
  func.func @transform_4(%arg0: i32, %arg1: i32) -> (i32, i32) {
    %c0_i32 = arith.constant 0 : i32
    %c0_i32_0 = arith.constant 0 : i32
    return %arg1, %c0_i32 : i32, i32
  }
}

</mosaic_0001>

<bundles_post_ra>
// kernel: tpu_custom_call.1
= control target key start
LH: loop header
LB: loop body
LE: loop exit
PB: predicated region body
PF: predicated region fallthrough
CT: control target
= control target key end

     0   :  { %s2291_s0 = inlined_call_operand.hbm [shape: bf16[256,128], index: 0, kind: input, shape index: {}]   ;;  %s2292_s1 = inlined_call_operand.hbm [shape: bf16[256,256], index: 1, kind: input, shape index: {}]   ;;  %s2293_s2 = inlined_call_operand.hbm [shape: bf16[2,128,128], index: 2, kind: input, shape index: {}]   ;;  %s2294_s3 = inlined_call_operand.vmem [shape: f32[2,1,128], index: 3, kind: input, shape index: {}]   ;;  %s2295_s4 = inlined_call_operand.hbm [shape: f32[256,128], index: 4, kind: output, shape index: {}]  }
   0x1   :  { %2310 = sst [smem:[#allocation21_spill]] %s2292_s1 }
   0x2   :  { %9 = vsyncpa [#allocation5], 0 }
   0x3   :  { %10 = vsyncpa [#allocation8], 0 }
   0x4   :  { %12 = vsyncpa [#allocation8 + $0x1], 0 }
   0x5   :  { %13 = vsyncpa [#allocation6], 0 }
   0x6   :  { %15 = vsyncpa [#allocation6 + $0x1], 0  ;;  %s1809_s15 = smov 0   ;;  %s1811_s16 = smov 0  }
   0x7   :  { %s1813_s17 = smov 0   ;;  %s1815_s18 = smov 0  }
   0x8   :  { %s1817_s19 = smov 0   ;;  %s1819_s20 = smov 0  }
   0x9   :  { %s1821_s21 = smov 0   ;;  %s1823_s22 = smov 0  }
   0xa   :  { %s1825_s23 = smov 0   ;;  %s1827_s24 = smov 0  }
   0xb   :  { %s1829_s25 = smov 0  }
   0xc LB: > { %2311 = sst [smem:[#allocation15_spill]] %s1744_s18  ;;  %s30_s26 = sadd.s32 1, %s1764_s23  ;;  %s1772_s25 = sphi %s1829_s25, %s21_s25   ;;  %s1768_s24 = sphi %s1827_s24, %s2350_s24   ;;  %s1764_s23 = sphi %s1825_s23, %s2343_s23   ;;  %s1760_s22 = sphi %s1823_s22, %s2349_s22   ;;  %s1756_s21 = sphi %s1821_s21, %s2342_s21   ;;  %s1752_s20 = sphi %s1819_s20, %s2341_s20   ;;  %s1748_s19 = sphi %s1817_s19, %s2348_s19   ;;  %s1744_s18 = sphi %s1815_s18, %s2347_s18   ;;  %s1740_s17 = sphi %s1813_s17, %s2346_s17   ;;  %s1736_s16 = sphi %s1811_s16, %s2345_s16   ;;  %s1732_s15 = sphi %s1809_s15, %s2344_s15  }
   0xd   : > { %2312 = sst [smem:[#allocation16_spill]] %s1752_s20  ;;  %s61_s27 = sadd.s32 1, %s1752_s20 }
   0xe   : > { %2313 = sst [smem:[#allocation17_spill]] %s1764_s23  ;;  %p1866_p0 = scmp.ge.s32.totalorder %s30_s26, 2 }
   0xf   : > { %p2299_p1 = scmp.ne.s32.totalorder %s1752_s20, %s1748_s19  ;;  %p2298_p2 = scmp.eq.s32.totalorder %s1772_s25, 0 }
  0x10   : > { %s2314_s28 = scalar_select %p1866_p0, 1, 0 }
  0x11   : > { %s2352_s26 = smov (%p1866_p0, %s30_s26), 0  ;;  %p70_p3 = por %p2298_p2, %p2299_p1 }
  0x12   : > { %2315 = sst [smem:[#allocation18_spill]] %s2352_s26  ;;  %p2297_p4 = scmp.lt.s32.totalorder %s1772_s25, 4 }
  0x13   : > { %s58_s29 = ssub.s32 %s1764_s23, %s2352_s26  ;;  %s189_s30 = sand.u32 1, %s1772_s25  }
  0x14   : > { %p59_p5 = scmp.eq.s32.totalorder %s58_s29, 0  ;;  %s191_s5 = sand.u32 1, %s1752_s20  }
  0x15   : > { %s1211_s6 = sshll.u32 %s1764_s23, 11  ;;  %s1147_s8 = sshll.u32 %s191_s5, 7 }
  0x16   : > { %s1889_s7 = scalar_select %p59_p5, %s1752_s20, %s61_s27  }
  0x17   : > { %s2317_s1 = sld [smem:[#allocation21_spill]]  ;;  %p1898_p6 = pnand %p2297_p4, %p70_p3 }
  0x18   : > { %2316 = sst [smem:[#allocation19_spill]] %s1889_s7  ;;  %s193_s13 = scalar_lea.vmem [#allocation7], %s1147_s8 }
  0x19   : > { %s201_s14 = sshll.u32 %s193_s13, 4  ;;  %s1904_s27 = scalar_lea.sflag [#allocation8], %s189_s30  ;;  %s1902_s14 = int_to_ptr.vmem [resolvable:$true] %s201_s14 }
  0x1a   : > { %p1556_p8 = pneg %p1898_p6 }
  0x1d   : > { %s1894_s11 = scalar_lea.hbm %s2317_s1, %s1211_s6  ;;  %s1559_s9 = scalar_lea.hbm %s2317_s1, 4096 }
  0x1e   : > { %s1554_s29 = scalar_lea.hbm %s1894_s11, 2048  ;;  %p1560_p11 = scmp.lt.u32.totalorder %s1894_s11, %s2317_s1 }
  0x1f   : > { %p1555_p7 = scmp.ne.s32.totalorder %s1894_s11, %s1554_s29  ;;  %p1561_p12 = scmp.lt.u32.totalorder %s1559_s9, %s1554_s29 }
  0x20   : > { %p1563_p3 = scmp.lt.u32.totalorder %s1554_s29, %s1894_s11 }
  0x21   : > { %p1557_p9 = pnand %p1556_p8, %p1555_p7  ;;  %p1562_p13 = por %p1561_p12, %p1560_p11 }
  0x23   : > { %p1558_p10 = pneg %p1557_p9  ;;  %p1564_p5 = por %p1563_p3, %p1562_p13 }
  0x25   : > { %p1565_p4 = pnand %p1564_p5, %p1558_p10 }
  0x27   : > { %1568 = shalt.err (!%p1565_p4)
}
  0x28   : > { %s1569_s30 = scalar_lea.vmem %s1902_s14, 2048  ;;  %s1774_s8 = smov [#allocation7]  }
  0x29   : > { %p1570_p7 = scmp.ne.s32.totalorder %s1902_s14, %s1569_s30  ;;  %s1574_s13 = sshll.u32 %s1774_s8, 4  ;;  %s1575_s13 = int_to_ptr.vmem [resolvable:$false] %s1574_s13 }
  0x2a   : > { %s1576_s26 = scalar_lea.vmem %s1575_s13, 4096  ;;  %p1577_p1 = scmp.lt.s32.totalorder %s1902_s14, %s1575_s13 }
  0x2b   : > { %p1572_p9 = pnand %p1570_p7, %p1556_p8  ;;  %p1578_p11 = scmp.lt.s32.totalorder %s1576_s26, %s1569_s30 }
  0x2d   : > { %p1573_p2 = pneg %p1572_p9  ;;  %p1579_p12 = por %p1578_p11, %p1577_p1 }
  0x2f   : > { %p1580_p13 = pnand %p1579_p12, %p1573_p2 }
  0x31   : > { %1583 = shalt.err (!%p1580_p13)
}
  0x32   : > { %s1775_s29 = smov 128   ;;  %s1776_s5 = smov 8  }
  0x33   : > { %1399 = dma.hbm_to_vmem [thread:$0]  (!%p1898_p6), %s1894_s11, 2048, %s1902_s14, %s1904_s27, %s1775_s29, %s1775_s29, %s1776_s5  }
  0x34   : > { %s1933_s6 = sadd.s32 4294967295, %s1772_s25   ;;  %s1143_s9 = sadd.s32 4294967294, %s1772_s25  }
  0x35   : > { %p74_p1 = scmp.ne.s32.totalorder %s1748_s19, %s1744_s18  ;;  %p2302_p2 = scmp.eq.s32.totalorder %s1933_s6, 0 }
  0x36   : > { %p100_p4 = scmp.ne.s32.totalorder %s1736_s16, %s1732_s15  ;;  %p150_p8 = scmp.eq.s32.totalorder %s1933_s6, 3 }
  0x37   : > { %p156_p10 = scmp.eq.s32.totalorder %s1143_s9, 3  ;;  %p1944_p3 = por %p2302_p2, %p74_p1 }
  0x38   : > { %p1950_p6 = por %p100_p4, %p2302_p2  ;;  %p2321_p5 = scmp.ne.s32.totalorder %s1752_s20, %s1748_s19 }
  0x39   : > { %s2319_s10 = scalar_select %p1944_p3, 1, 0 }
  0x3a   : > { %s2320_s11 = scalar_select %p1950_p6, 1, 0 }
  0x3b   : > { %p1957_p7 = por %p150_p8, %p2321_p5  ;;  %p1961_p9 = por %p156_p10, %p74_p1 }
  0x3c   : > { %p1144_p11 = scmp.ge.s32.totalorder %s1772_s25, 1  ;;  %p163_p12 = scmp.lt.s32.totalorder %s1772_s25, 5 }
  0x3d   : > { %s2322_s12 = scalar_select %p1957_p7, 1, 0 }
  0x3e   : > { %s2323_s14 = scalar_select %p1961_p9, 1, 0 }
  0x3f   : > { %p1967_p13 = pnand %p1144_p11, %p163_p12  ;;  %s1777_s30 = smov [#allocation4]  }
  0x40   : > { %2324 = sst [smem:[#allocation20_spill]] %s2323_s14  ;;  %s175_s8 = sshll.u32 %s1777_s30, 4  ;;  %s176_s8 = int_to_ptr.vmem [resolvable:$true] %s175_s8 }
  0x41   : > { %s2325_s15 = scalar_select %p1967_p13, 1, 0 }
  0x42   : > { %p1392_p4 = pneg %p1967_p13  ;;  %s33_s26 = sadd.s32 1, %s1768_s24 }
  0x43   : > { %s1584_s9 = scalar_lea.hbm %s2291_s0, 2048 }
  0x44   : > { %p1975_p8 = pnand %p1392_p4, %p2302_p2  ;;  %p1585_p1 = scmp.ne.s32.totalorder %s2291_s0, %s1584_s9 }
  0x45   : > { %p1591_p12 = scmp.lt.u32.totalorder %s1584_s9, %s2291_s0 }
  0x46   : > { %p1586_p10 = pneg %p1975_p8 }
  0x48   : > { %p1587_p5 = pnand %p1586_p10, %p1585_p1 }
  0x4a   : > { %p1588_p11 = pneg %p1587_p5 }
  0x4c   : > { %p1593_p4 = pnand %p1591_p12, %p1588_p11 }
  0x4e   : > { %1596 = shalt.err (!%p1593_p4)
}
  0x4f   : > { %s1597_s20 = scalar_lea.vmem %s176_s8, 2048  ;;  %p1605_p6 = scmp.lt.s32.totalorder %s176_s8, %s176_s8 }
  0x50   : > { %p1598_p2 = scmp.ne.s32.totalorder %s176_s8, %s1597_s20  ;;  %p1606_p3 = scmp.lt.s32.totalorder %s1597_s20, %s1597_s20 }
  0x52   : > { %p1600_p9 = pnand %p1598_p2, %p1586_p10  ;;  %p1607_p13 = por %p1606_p3, %p1605_p6 }
  0x54   : > { %p1601_p7 = pneg %p1600_p9 }
  0x56   : > { %p1608_p0 = pnand %p1607_p13, %p1601_p7 }
  0x58   : > { %1611 = shalt.err (!%p1608_p0)
}
  0x59   : > { %s1778_s1 = smov 64   ;;  %s1779_s23 = smov 4  }
  0x5a   : > { %1395 = dma.hbm_to_vmem [thread:$0]  (!%p1975_p8), %s2291_s0, 2048, %s176_s8, [#allocation5], %s1778_s1, %s1778_s1, %s1779_s23  }
  0x5b   : > { %p2327_p0 = scmp.ne.s32.totalorder %s2314_s28, 0  ;;  %p94_p2 = scmp.ne.s32.totalorder %s1740_s17, %s1736_s16 }
  0x5c   : > { %s213_s29 = sand.u32 1, %s1740_s17   ;;  %p2328_p6 = scmp.eq.s32.totalorder %s1772_s25, 0 }
  0x5d   : > { %s2354_s26 = smov (!%p2327_p0, %s33_s26), %s1768_s24  ;;  %s1151_s5 = sshll.u32 %s213_s29, 6 }
  0x5e   : > { %p35_p3 = scmp.ge.s32.totalorder %s2354_s26, 2  ;;  %p96_p7 = por %p94_p2, %p2328_p6 }
  0x5f   : > { %s1212_s13 = sshll.u32 %s1768_s24, 10  ;;  %s215_s9 = scalar_lea.vmem [#allocation9], %s1151_s5 }
  0x60   : > { %s2356_s26 = smov (%p35_p3, %s2354_s26), 0  ;;  %s222_s30 = sshll.u32 %s215_s9, 4  ;;  %s2018_s30 = int_to_ptr.vmem [resolvable:$true] %s222_s30 }
  0x61   : > { %s84_s14 = ssub.s32 %s1768_s24, %s2356_s26  ;;  %s87_s18 = sadd.s32 1, %s1740_s17 }
  0x62   : > { %p85_p9 = scmp.eq.s32.totalorder %s84_s14, 0  ;;  %s2016_s20 = scalar_lea.hbm %s2293_s2, %s1212_s13 }
  0x63   : > { %p2329_p13 = scmp.lt.s32.totalorder %s1772_s25, 4  ;;  %s1612_s14 = scalar_lea.hbm %s2016_s20, 1024 }
  0x64   : > { %s2027_s29 = scalar_select %p85_p9, %s1740_s17, %s87_s18  }
  0x65   : > { %p2022_p8 = pnand %p2329_p13, %p96_p7  ;;  %p1613_p1 = scmp.ne.s32.totalorder %s2016_s20, %s1612_s14 }
  0x66   : > { %s1617_s9 = scalar_lea.hbm %s2293_s2, 2048  ;;  %p1618_p12 = scmp.lt.u32.totalorder %s2016_s20, %s2293_s2 }
  0x67   : > { %p1614_p10 = pneg %p2022_p8  ;;  %p1619_p4 = scmp.lt.u32.totalorder %s1617_s9, %s1612_s14 }
  0x68   : > { %p1621_p2 = scmp.lt.u32.totalorder %s1612_s14, %s2016_s20 }
  0x69   : > { %p1615_p5 = pnand %p1614_p10, %p1613_p1  ;;  %p1620_p0 = por %p1619_p4, %p1618_p12 }
  0x6b   : > { %p1616_p11 = pneg %p1615_p5  ;;  %p1622_p3 = por %p1621_p2, %p1620_p0 }
  0x6d   : > { %p1623_p6 = pnand %p1622_p3, %p1616_p11 }
  0x6f   : > { %1626 = shalt.err (!%p1623_p6)
}
  0x70   : > { %s1627_s18 = scalar_lea.vmem %s2018_s30, 1024  ;;  %s1780_s5 = smov [#allocation9]  }
  0x71   : > { %p1628_p7 = scmp.ne.s32.totalorder %s2018_s30, %s1627_s18  ;;  %s1632_s13 = sshll.u32 %s1780_s5, 4  ;;  %s1633_s13 = int_to_ptr.vmem [resolvable:$false] %s1632_s13 }
  0x72   : > { %s1634_s8 = scalar_lea.vmem %s1633_s13, 2048  ;;  %p1635_p1 = scmp.lt.s32.totalorder %s2018_s30, %s1633_s13 }
  0x73   : > { %p1630_p9 = pnand %p1628_p7, %p1614_p10  ;;  %p1636_p5 = scmp.lt.s32.totalorder %s1634_s8, %s1627_s18 }
  0x75   : > { %p1631_p13 = pneg %p1630_p9  ;;  %p1637_p12 = por %p1636_p5, %p1635_p1 }
  0x77   : > { %p1638_p4 = pnand %p1637_p12, %p1631_p13 }
  0x79   : > { %1641 = shalt.err (!%p1638_p4)
}
  0x7a   : > { %1402 = dma.hbm_to_vmem [thread:$0]  (!%p2022_p8), %s2016_s20, 1024, %s2018_s30, %s1904_s27, %s1778_s1, %s1778_s1, %s1779_s23  }
  0x7b   : > { %p2331_p10 = scmp.ne.s32.totalorder %s2325_s15, 0 }
  0x7c   : > { %p2332_p11 = scmp.eq.s32.totalorder (!%p2331_p10), %s1933_s6, 0 }
  0x7d   : > { %240 = sbr.rel (%p2331_p10) target bundleno = 747 (0x2eb), region = 36 }
  0x84   : > { %1715 = dma.done.wait (%p2332_p11), [#allocation5], 2048   ;;  %p2333_p0 = pmov %p2332_p11 }
  0x85   : > { %s246_s7 = sand.u32 1, %s1933_s6   ;;  %s248_s14 = sand.u32 1, %s1748_s19  }
  0x86   : > { %1717 = vsyncadd (%p2333_p0), [#allocation5], 4294965248  ;;  %s1156_s9 = sshll.u32 %s248_s14, 7  ;;  %s247_s28 = scalar_lea.sflag [#allocation8], %s246_s7 }
  0x87   : > { %s2068_s18 = scalar_lea.vmem [#allocation7], %s1156_s9  ;;  %p2334_p8 = scmp.ne.s32.totalorder %s2319_s10, 0 }
  0x89   : > { %1719 = dma.done.wait (%p2334_p8), %s247_s28, 2048  }
  0x8a   : > { %1721 = vsyncadd (%p2334_p8), %s247_s28, 4294965248  ;;  %s257_s27 = sand.u32 1, %s1736_s16   ;;  %p2335_p2 = scmp.ne.s32.totalorder %s2320_s11, 0 }
  0x8b   : > { %s1157_s15 = sshll.u32 %s257_s27, 6 }
  0x8c   : > { %s2075_s1 = scalar_lea.vmem [#allocation9], %s1157_s15 }
  0x8d   : > { %1723 = dma.done.wait (%p2335_p2), %s247_s28, 1024  }
  0x8e   : > { %1725 = vsyncadd (%p2335_p2), %s247_s28, 4294966272  ;;  %p293_p3 = scmp.lt.s32.totalorder %s1760_s22, 1  ;;  %p298_p6 = scmp.eq.s32.totalorder %s1760_s22, 0 }
  0x8f   : > { %p299_p7 = scmp.eq.s32.totalorder %s1756_s21, 0  ;;  %s2091_s20 = scalar_lea.vmem [#allocation10], %s1156_s9 }
  0x90   : > { %s2085_s6 = scalar_select %p293_p3, %s1760_s22, 1 }
  0x91   : > { %p300_p9 = pnand %p299_p7, %p298_p6 }
  0x92   : > { %s295_s30 = scalar_lea.vmem %s2294_s3, %s2085_s6  ;;  %v1506_v0 = vld [vmem:[#allocation4] sm:$0xff] (!%p300_p9)   ;;  %v1507_v1 = vld [vmem:[#allocation4 + $0x8] sm:$0xff] (!%p300_p9)   ;;  %v1508_v2 = vld [vmem:[#allocation4 + $0x10] sm:$0xff] (!%p300_p9)  }
  0x93   : > { %303 = sbr.rel (%p300_p9) target bundleno = 155 (0x9b), region = 52  ;;  %432 = vst [vmem:[#allocation2] sm:$0xff] (!%p300_p9), %v1506_v0  ;;  %433 = vst [vmem:[#allocation2 + $0x8] sm:$0xff] (!%p300_p9), %v1507_v1  ;;  %v1509_v3 = vld [vmem:[#allocation4 + $0x18] sm:$0xff] (!%p300_p9)   ;;  %v1510_v4 = vld [vmem:[#allocation4 + $0x20] sm:$0xff] (!%p300_p9)  }
  0x94   : > { %434 = vst [vmem:[#allocation2 + $0x10] sm:$0xff] (!%p300_p9), %v1508_v2  ;;  %435 = vst [vmem:[#allocation2 + $0x18] sm:$0xff] (!%p300_p9), %v1509_v3  ;;  %v1511_v5 = vld [vmem:[#allocation4 + $0x28] sm:$0xff] (!%p300_p9)   ;;  %v1512_v6 = vld [vmem:[#allocation4 + $0x30] sm:$0xff] (!%p300_p9)  }
  0x95   : > { %436 = vst [vmem:[#allocation2 + $0x20] sm:$0xff] (!%p300_p9), %v1510_v4  ;;  %437 = vst [vmem:[#allocation2 + $0x28] sm:$0xff] (!%p300_p9), %v1511_v5  ;;  %v1513_v7 = vld [vmem:[#allocation4 + $0x38] sm:$0xff] (!%p300_p9)   ;;  %v1514_v8 = vld [vmem:[#allocation4 + $0x40] sm:$0xff] (!%p300_p9)  }
  0x96   : > { %438 = vst [vmem:[#allocation2 + $0x30] sm:$0xff] (!%p300_p9), %v1512_v6  ;;  %439 = vst [vmem:[#allocation2 + $0x38] sm:$0xff] (!%p300_p9), %v1513_v7  ;;  %v1515_v9 = vld [vmem:[#allocation4 + $0x48] sm:$0xff] (!%p300_p9)   ;;  %v1516_v10 = vld [vmem:[#allocation4 + $0x50] sm:$0xff] (!%p300_p9)  }
  0x97   : > { %440 = vst [vmem:[#allocation2 + $0x40] sm:$0xff] (!%p300_p9), %v1514_v8  ;;  %441 = vst [vmem:[#allocation2 + $0x48] sm:$0xff] (!%p300_p9), %v1515_v9  ;;  %v1517_v11 = vld [vmem:[#allocation4 + $0x58] sm:$0xff] (!%p300_p9)   ;;  %v1518_v12 = vld [vmem:[#allocation4 + $0x60] sm:$0xff] (!%p300_p9)  }
  0x98   : > { %442 = vst [vmem:[#allocation2 + $0x50] sm:$0xff] (!%p300_p9), %v1516_v10  ;;  %443 = vst [vmem:[#allocation2 + $0x58] sm:$0xff] (!%p300_p9), %v1517_v11  ;;  %v1519_v13 = vld [vmem:[#allocation4 + $0x68] sm:$0xff] (!%p300_p9)   ;;  %v1520_v14 = vld [vmem:[#allocation4 + $0x70] sm:$0xff] (!%p300_p9)  }
  0x99   : > { %444 = vst [vmem:[#allocation2 + $0x60] sm:$0xff] (!%p300_p9), %v1518_v12  ;;  %445 = vst [vmem:[#allocation2 + $0x68] sm:$0xff] (!%p300_p9), %v1519_v13  ;;  %v1521_v15 = vld [vmem:[#allocation4 + $0x78] sm:$0xff] (!%p300_p9)  }
  0x9a   : > { %446 = vst [vmem:[#allocation2 + $0x70] sm:$0xff] %v1520_v14  ;;  %447 = vst [vmem:[#allocation2 + $0x78] sm:$0xff] %v1521_v15 }
  0x9b PF: > { %p1175_p13 = scmp.ne.s32.totalorder %s1756_s21, 0 }
  0x9c   : > { %v1522_v16 = vld [vmem:[%s2075_s1] sm:$0xff] (!%p1175_p13)   ;;  %v1523_v17 = vld [vmem:[%s2075_s1 + $0x8] sm:$0xff] (!%p1175_p13)   ;;  %v1524_v18 = vld [vmem:[%s2075_s1 + $0x10] sm:$0xff] (!%p1175_p13)  }
  0x9d   : > { %450 = sbr.rel (%p1175_p13) target bundleno = 431 (0x1af), region = 56  ;;  %1302 = vmatprep.subr.bf16.mxu0 (!%p1175_p13), %v1522_v16  ;;  %1350 = vmatprep.subr.bf16.mxu1 (!%p1175_p13), %v1522_v16  ;;  %v1525_v19 = vld [vmem:[%s2075_s1 + $0x18] sm:$0xff] (!%p1175_p13)   ;;  %v451_v20 = vld [vmem:[#allocation2] sm:$0xff] (!%p1175_p13)  ;;  %v1527_v23 = vld [vmem:[%s2075_s1 + $0x28] sm:$0xff] (!%p1175_p13)  }
  0x9e   : > { %1303 = vmatpush3.bf16.msra.mxu0 (!%p1175_p13), %v1522_v16  ;;  %1358 = vmatpush3.bf16.msra.mxu1 (!%p1175_p13), %v1522_v16  ;;  %v1526_v22 = vld [vmem:[%s2075_s1 + $0x20] sm:$0xff] (!%p1175_p13)   ;;  %v1528_v24 = vld [vmem:[%s2075_s1 + $0x30] sm:$0xff] (!%p1175_p13)   ;;  %v1529_v25 = vld [vmem:[%s2075_s1 + $0x38] sm:$0xff] (!%p1175_p13)  }
  0x9f   : > { %1304 = vmatprep.subr.bf16.mxu0 (!%p1175_p13), %v1523_v17  ;;  %1351 = vmatprep.subr.bf16.mxu1 (!%p1175_p13), %v1523_v17  ;;  %v459_v21 = vld [vmem:[#allocation2 + $0x40] sm:$0xff] (!%p1175_p13)  ;;  %v452_v26 = vld [vmem:[#allocation2 + $0x8] sm:$0xff] (!%p1175_p13)  ;;  %v453_v28 = vld [vmem:[#allocation2 + $0x10] sm:$0xff] (!%p1175_p13) }
  0xa0   : > { %1318 = vmatprep.mubr.bf16.mxu0 (!%p1175_p13), %v451_v20  ;;  %1334 = vmatprep.mubr.bf16.mxu1 (!%p1175_p13), %v459_v21  ;;  %v460_v27 = vld [vmem:[#allocation2 + $0x48] sm:$0xff] (!%p1175_p13)  ;;  %v461_v29 = vld [vmem:[#allocation2 + $0x50] sm:$0xff] (!%p1175_p13)  ;;  %v454_v30 = vld [vmem:[#allocation2 + $0x18] sm:$0xff] (!%p1175_p13) }
  0xa1   : > { %v462_v31 = vld [vmem:[#allocation2 + $0x58] sm:$0xff] (!%p1175_p13)  ;;  %v455_v32 = vld [vmem:[#allocation2 + $0x20] sm:$0xff] (!%p1175_p13)  ;;  %v456_v34 = vld [vmem:[#allocation2 + $0x28] sm:$0xff] (!%p1175_p13) }
  0xa2   : > { %1305 = vmatpush3.bf16.msra.mxu0 (!%p1175_p13), %v1523_v17  ;;  %1359 = vmatpush3.bf16.msra.mxu1 (!%p1175_p13), %v1523_v17  ;;  %v463_v33 = vld [vmem:[#allocation2 + $0x60] sm:$0xff] (!%p1175_p13)  ;;  %v464_v35 = vld [vmem:[#allocation2 + $0x68] sm:$0xff] (!%p1175_p13)  ;;  %v457_v36 = vld [vmem:[#allocation2 + $0x30] sm:$0xff] (!%p1175_p13) }
  0xa3   : > { %1306 = vmatprep.subr.bf16.mxu0 (!%p1175_p13), %v1524_v18  ;;  %1352 = vmatprep.subr.bf16.mxu1 (!%p1175_p13), %v1524_v18  ;;  %v465_v37 = vld [vmem:[#allocation2 + $0x70] sm:$0xff] (!%p1175_p13)  ;;  %v458_v38 = vld [vmem:[#allocation2 + $0x38] sm:$0xff] (!%p1175_p13) }
  0xa4   : > { %v466_v39 = vld [vmem:[#allocation2 + $0x78] sm:$0xff] }
  0xa6   : > { %1307 = vmatpush3.bf16.msra.mxu0 %v1524_v18  ;;  %1360 = vmatpush3.bf16.msra.mxu1 %v1524_v18 }
  0xa7   : > { %1308 = vmatprep.subr.bf16.mxu0 %v1525_v19  ;;  %1353 = vmatprep.subr.bf16.mxu1 %v1525_v19 }
  0xaa   : > { %1309 = vmatpush3.bf16.msra.mxu0 %v1525_v19  ;;  %1361 = vmatpush3.bf16.msra.mxu1 %v1525_v19 }
  0xab   : > { %1310 = vmatprep.subr.bf16.mxu0 %v1526_v22  ;;  %1354 = vmatprep.subr.bf16.mxu1 %v1526_v22 }
  0xae   : > { %1311 = vmatpush3.bf16.msra.mxu0 %v1526_v22  ;;  %1362 = vmatpush3.bf16.msra.mxu1 %v1526_v22 }
  0xaf   : > { %1312 = vmatprep.subr.bf16.mxu0 %v1527_v23  ;;  %1355 = vmatprep.subr.bf16.mxu1 %v1527_v23 }
  0xb2   : > { %1313 = vmatpush3.bf16.msra.mxu0 %v1527_v23  ;;  %1363 = vmatpush3.bf16.msra.mxu1 %v1527_v23 }
  0xb3   : > { %1314 = vmatprep.subr.bf16.mxu0 %v1528_v24  ;;  %1356 = vmatprep.subr.bf16.mxu1 %v1528_v24 }
  0xb6   : > { %1315 = vmatpush3.bf16.msra.mxu0 %v1528_v24  ;;  %1364 = vmatpush3.bf16.msra.mxu1 %v1528_v24 }
  0xb7   : > { %1316 = vmatprep.subr.bf16.mxu0 %v1529_v25  ;;  %1357 = vmatprep.subr.bf16.mxu1 %v1529_v25 }
  0xba   : > { %1317 = vmatpush3.bf16.msra.mxu0 %v1529_v25  ;;  %1365 = vmatpush3.bf16.msra.mxu1 %v1529_v25 }
  0xbd   : > { %1319 = vmatmul.mubr.bf16.vlgmr.msra.gmra.mrb[0].mxu0 %v452_v26  ;;  %1335 = vmatmul.mubr.bf16.vlgmr.msra.gmra.mrb[0].mxu1 %v460_v27 }
  0xbe   : > { %1322 = vmatprep.mubr.bf16.mxu0 %v453_v28  ;;  %1338 = vmatprep.mubr.bf16.mxu1 %v461_v29 }
  0xc5   : > { %1323 = vmatmul.mubr.bf16.gmra.mrb[4].mxu0 %v454_v30  ;;  %1339 = vmatmul.mubr.bf16.gmra.mrb[4].mxu1 %v462_v31 }
  0xc6   : > { %1326 = vmatprep.mubr.bf16.mxu0 %v455_v32  ;;  %1342 = vmatprep.mubr.bf16.mxu1 %v463_v33 }
  0xcd   : > { %1327 = vmatmul.mubr.bf16.gmra.mrb[8].mxu0 %v456_v34  ;;  %1343 = vmatmul.mubr.bf16.gmra.mrb[8].mxu1 %v464_v35 }
  0xce   : > { %1330 = vmatprep.mubr.bf16.mxu0 %v457_v36  ;;  %1346 = vmatprep.mubr.bf16.mxu1 %v465_v37 }
  0xd5   : > { %1331 = vmatmul.mubr.bf16.gmra.mrb[12].mxu0 %v458_v38  ;;  %1347 = vmatmul.mubr.bf16.gmra.mrb[12].mxu1 %v466_v39 }
 0x190   : > { %v1320_v40 = vpop.f32.mrb[0].mxu0  ;;  %v1336_v41 = vpop.f32.mrb[0].mxu1 }
 0x191   : > { %v565_v42 = vpop.f32.mrb[1].mxu0  ;;  %v629_v43 = vpop.f32.mrb[1].mxu1 }
 0x192   : > { %v1321_v44 = vpop.f32.mrb[2].mxu0  ;;  %v1337_v45 = vpop.f32.mrb[2].mxu1 }
 0x193   : > { %v693_v46 = vpack.c.bf16 %v1321_v44, %v1320_v40  ;;  %v701_v47 = vpack.c.bf16 %v1337_v45, %v1336_v41  ;;  %v568_v48 = vpop.f32.mrb[3].mxu0  ;;  %v632_v49 = vpop.f32.mrb[3].mxu1 }
 0x194   : > { %v692_v50 = vpack.c.bf16 %v568_v48, %v565_v42  ;;  %v700_v51 = vpack.c.bf16 %v632_v49, %v629_v43 }
 0x195   : > { %709 = vst [vmem:[#allocation3 + $0x8] sm:$0xff] %v693_v46  ;;  %717 = vst [vmem:[#allocation3 + $0x48] sm:$0xff] %v701_v47 }
 0x196   : > { %708 = vst [vmem:[#allocation3] sm:$0xff] %v692_v50  ;;  %716 = vst [vmem:[#allocation3 + $0x40] sm:$0xff] %v700_v51 }
 0x198   : > { %v1324_v52 = vpop.f32.mrb[4].mxu0  ;;  %v1340_v53 = vpop.f32.mrb[4].mxu1 }
 0x199   : > { %v581_v54 = vpop.f32.mrb[5].mxu0  ;;  %v645_v55 = vpop.f32.mrb[5].mxu1 }
 0x19a   : > { %v1325_v56 = vpop.f32.mrb[6].mxu0  ;;  %v1341_v57 = vpop.f32.mrb[6].mxu1 }
 0x19b   : > { %v695_v58 = vpack.c.bf16 %v1325_v56, %v1324_v52  ;;  %v703_v59 = vpack.c.bf16 %v1341_v57, %v1340_v53  ;;  %v584_v60 = vpop.f32.mrb[7].mxu0  ;;  %v648_v61 = vpop.f32.mrb[7].mxu1 }
 0x19c   : > { %v694_v62 = vpack.c.bf16 %v584_v60, %v581_v54  ;;  %v702_v63 = vpack.c.bf16 %v648_v61, %v645_v55 }
 0x19d   : > { %711 = vst [vmem:[#allocation3 + $0x18] sm:$0xff] %v695_v58  ;;  %719 = vst [vmem:[#allocation3 + $0x58] sm:$0xff] %v703_v59 }
 0x19e   : > { %710 = vst [vmem:[#allocation3 + $0x10] sm:$0xff] %v694_v62  ;;  %718 = vst [vmem:[#allocation3 + $0x50] sm:$0xff] %v702_v63 }
 0x1a0   : > { %v1328_v0 = vpop.f32.mrb[8].mxu0  ;;  %v1344_v1 = vpop.f32.mrb[8].mxu1 }
 0x1a1   : > { %v597_v2 = vpop.f32.mrb[9].mxu0  ;;  %v661_v3 = vpop.f32.mrb[9].mxu1 }
 0x1a2   : > { %v1329_v4 = vpop.f32.mrb[10].mxu0  ;;  %v1345_v5 = vpop.f32.mrb[10].mxu1 }
 0x1a3   : > { %v697_v6 = vpack.c.bf16 %v1329_v4, %v1328_v0  ;;  %v705_v7 = vpack.c.bf16 %v1345_v5, %v1344_v1  ;;  %v600_v8 = vpop.f32.mrb[11].mxu0  ;;  %v664_v9 = vpop.f32.mrb[11].mxu1 }
 0x1a4   : > { %v696_v10 = vpack.c.bf16 %v600_v8, %v597_v2  ;;  %v704_v11 = vpack.c.bf16 %v664_v9, %v661_v3 }
 0x1a5   : > { %713 = vst [vmem:[#allocation3 + $0x28] sm:$0xff] %v697_v6  ;;  %721 = vst [vmem:[#allocation3 + $0x68] sm:$0xff] %v705_v7 }
 0x1a6   : > { %712 = vst [vmem:[#allocation3 + $0x20] sm:$0xff] %v696_v10  ;;  %720 = vst [vmem:[#allocation3 + $0x60] sm:$0xff] %v704_v11 }
 0x1a8   : > { %v1332_v12 = vpop.f32.mrb[12].mxu0  ;;  %v1348_v13 = vpop.f32.mrb[12].mxu1 }
 0x1a9   : > { %v613_v14 = vpop.f32.mrb[13].mxu0  ;;  %v677_v15 = vpop.f32.mrb[13].mxu1 }
 0x1aa   : > { %v1333_v16 = vpop.f32.mrb[14].mxu0  ;;  %v1349_v17 = vpop.f32.mrb[14].mxu1 }
 0x1ab   : > { %v699_v18 = vpack.c.bf16 %v1333_v16, %v1332_v12  ;;  %v707_v19 = vpack.c.bf16 %v1349_v17, %v1348_v13  ;;  %v616_v20 = vpop.f32.mrb[15].mxu0  ;;  %v680_v21 = vpop.f32.mrb[15].mxu1 }
 0x1ac   : > { %v698_v22 = vpack.c.bf16 %v616_v20, %v613_v14  ;;  %v706_v23 = vpack.c.bf16 %v680_v21, %v677_v15 }
 0x1ad   : > { %715 = vst [vmem:[#allocation3 + $0x38] sm:$0xff] %v699_v18  ;;  %723 = vst [vmem:[#allocation3 + $0x78] sm:$0xff] %v707_v19 }
 0x1ae   : > { %714 = vst [vmem:[#allocation3 + $0x30] sm:$0xff] %v698_v22  ;;  %722 = vst [vmem:[#allocation3 + $0x70] sm:$0xff] %v706_v23 }
 0x1af PF: > { %v748_v24 = vld [vmem:[#allocation3 + $0x40] sm:$0xff]  ;;  %v749_v26 = vld [vmem:[#allocation3 + $0x48] sm:$0xff]  ;;  %v750_v28 = vld [vmem:[#allocation3 + $0x50] sm:$0xff]  ;;  %p1201_p1 = scmp.ge.s32.totalorder %s1760_s22, 1 }
 0x1b0   : > { %v740_v25 = vld [vmem:[#allocation3] sm:$0xff]  ;;  %1238 = vmatprep.subr.bf16.mxu0 %v748_v24  ;;  %1366 = vmatprep.subr.bf16.mxu1 %v748_v24  ;;  %v741_v27 = vld [vmem:[#allocation3 + $0x8] sm:$0xff]  ;;  %v742_v30 = vld [vmem:[#allocation3 + $0x10] sm:$0xff]  ;;  %s1202_s13 = sshll.u32 (!%p1201_p1), %s1756_s21, 7 }
 0x1b1   : > { %1239 = vmatpush3.bf16.msra.mxu0 %v740_v25  ;;  %1374 = vmatpush3.bf16.msra.mxu1 %v740_v25  ;;  %v1532_v29 = vld [vmem:[%s2068_s18 + $0x4] ss:$8 sps:$4 sm:$0xff]   ;;  %v751_v32 = vld [vmem:[#allocation3 + $0x58] sm:$0xff]  ;;  %v1530_v42 = vld [vmem:[%s2068_s18] ss:$8 sps:$4 sm:$0xff]   ;;  %s969_s8 = sshra.s32 (!%p1201_p1), %s1202_s13, 4 }
 0x1b2   : > { %1240 = vmatprep.subr.bf16.mxu0 %v749_v26  ;;  %1367 = vmatprep.subr.bf16.mxu1 %v749_v26  ;;  %v1535_v31 = vld [vmem:[%s2068_s18 + $0x44] ss:$8 sps:$4 sm:$0xff]   ;;  %v743_v33 = vld [vmem:[#allocation3 + $0x18] sm:$0xff]  ;;  %v1533_v43 = vld [vmem:[%s2068_s18 + $0x40] ss:$8 sps:$4 sm:$0xff]   ;;  %s1203_s7 = sshll.u32 (!%p1201_p1), %s969_s8, 3 }
 0x1b3   : > { %875 = vmatprep.mubr.bf16.mxu0 %v1532_v29  ;;  %907 = vmatprep.mubr.bf16.mxu1 %v1535_v31  ;;  %v752_v34 = vld [vmem:[#allocation3 + $0x60] sm:$0xff]  ;;  %v753_v36 = vld [vmem:[#allocation3 + $0x68] sm:$0xff]  ;;  %v1536_v44 = vld [vmem:[%s2068_s18 + $0x14] ss:$8 sps:$4 sm:$0xff]   ;;  %s972_s9 = scalar_lea.vmem (!%p1201_p1), [#allocation2], %s1203_s7 }
 0x1b4   : > { %v744_v35 = vld [vmem:[#allocation3 + $0x20] sm:$0xff]  ;;  %v745_v37 = vld [vmem:[#allocation3 + $0x28] sm:$0xff]  ;;  %v755_v40 = vld [vmem:[#allocation3 + $0x78] sm:$0xff] }
 0x1b5   : > { %1241 = vmatpush3.bf16.msra.mxu0 %v741_v27  ;;  %1375 = vmatpush3.bf16.msra.mxu1 %v741_v27  ;;  %v754_v38 = vld [vmem:[#allocation3 + $0x70] sm:$0xff]  ;;  %v747_v41 = vld [vmem:[#allocation3 + $0x38] sm:$0xff]  ;;  %v1542_v48 = vld [vmem:[%s2068_s18 + $0x24] ss:$8 sps:$4 sm:$0xff]  }
 0x1b6   : > { %1242 = vmatprep.subr.bf16.mxu0 %v750_v28  ;;  %1368 = vmatprep.subr.bf16.mxu1 %v750_v28  ;;  %v746_v39 = vld [vmem:[#allocation3 + $0x30] sm:$0xff]  ;;  %v1544_v49 = vld [vmem:[%s2068_s18 + $0x64] ss:$8 sps:$4 sm:$0xff]   ;;  %v1546_v50 = vld [vmem:[%s2068_s18 + $0x20] ss:$8 sps:$4 sm:$0xff]  }
 0x1b7   : > { %v1538_v45 = vld [vmem:[%s2068_s18 + $0x54] ss:$8 sps:$4 sm:$0xff]   ;;  %v1540_v46 = vld [vmem:[%s2068_s18 + $0x10] ss:$8 sps:$4 sm:$0xff]   ;;  %v1547_v51 = vld [vmem:[%s2068_s18 + $0x60] ss:$8 sps:$4 sm:$0xff]  }
 0x1b8   : > { %v1541_v47 = vld [vmem:[%s2068_s18 + $0x50] ss:$8 sps:$4 sm:$0xff]   ;;  %v1548_v52 = vld [vmem:[%s2068_s18 + $0x34] ss:$8 sps:$4 sm:$0xff]   ;;  %v2123_v58 = vld [vmem:[%s295_s30] ss:$0 sm:$0xff] }
 0x1b9   : > { %1243 = vmatpush3.bf16.msra.mxu0 %v742_v30  ;;  %1376 = vmatpush3.bf16.msra.mxu1 %v742_v30  ;;  %v1550_v53 = vld [vmem:[%s2068_s18 + $0x74] ss:$8 sps:$4 sm:$0xff]   ;;  %v1552_v54 = vld [vmem:[%s2068_s18 + $0x30] ss:$8 sps:$4 sm:$0xff]  }
 0x1ba   : > { %1244 = vmatprep.subr.bf16.mxu0 %v751_v32  ;;  %1369 = vmatprep.subr.bf16.mxu1 %v751_v32  ;;  %v1553_v55 = vld [vmem:[%s2068_s18 + $0x70] ss:$8 sps:$4 sm:$0xff]  }
 0x1bd   : > { %1245 = vmatpush3.bf16.msra.mxu0 %v743_v33  ;;  %1377 = vmatpush3.bf16.msra.mxu1 %v743_v33 }
 0x1be   : > { %1246 = vmatprep.subr.bf16.mxu0 %v752_v34  ;;  %1370 = vmatprep.subr.bf16.mxu1 %v752_v34 }
 0x1c1   : > { %1247 = vmatpush3.bf16.msra.mxu0 %v744_v35  ;;  %1378 = vmatpush3.bf16.msra.mxu1 %v744_v35 }
 0x1c2   : > { %1248 = vmatprep.subr.bf16.mxu0 %v753_v36  ;;  %1371 = vmatprep.subr.bf16.mxu1 %v753_v36 }
 0x1c5   : > { %1249 = vmatpush3.bf16.msra.mxu0 %v745_v37  ;;  %1379 = vmatpush3.bf16.msra.mxu1 %v745_v37 }
 0x1c6   : > { %1250 = vmatprep.subr.bf16.mxu0 %v754_v38  ;;  %1372 = vmatprep.subr.bf16.mxu1 %v754_v38 }
 0x1c9   : > { %1251 = vmatpush3.bf16.msra.mxu0 %v746_v39  ;;  %1380 = vmatpush3.bf16.msra.mxu1 %v746_v39 }
 0x1ca   : > { %1252 = vmatprep.subr.bf16.mxu0 %v755_v40  ;;  %1373 = vmatprep.subr.bf16.mxu1 %v755_v40 }
 0x1cd   : > { %1253 = vmatpush3.bf16.msra.mxu0 %v747_v41  ;;  %1381 = vmatpush3.bf16.msra.mxu1 %v747_v41 }
 0x1d0   : > { %876 = vmatmul.mubr.bf16.vlgmr.msra.gmra.mrb[0].mxu0 %v1530_v42  ;;  %908 = vmatmul.mubr.bf16.vlgmr.msra.gmra.mrb[0].mxu1 %v1533_v43 }
 0x1d1   : > { %883 = vmatprep.mubr.bf16.mxu0 %v1536_v44  ;;  %915 = vmatprep.mubr.bf16.mxu1 %v1538_v45 }
 0x1d8   : > { %884 = vmatmul.mubr.bf16.gmra.mrb[4].mxu0 %v1540_v46  ;;  %916 = vmatmul.mubr.bf16.gmra.mrb[4].mxu1 %v1541_v47 }
 0x1d9   : > { %891 = vmatprep.mubr.bf16.mxu0 %v1542_v48  ;;  %923 = vmatprep.mubr.bf16.mxu1 %v1544_v49 }
 0x1e0   : > { %892 = vmatmul.mubr.bf16.gmra.mrb[8].mxu0 %v1546_v50  ;;  %924 = vmatmul.mubr.bf16.gmra.mrb[8].mxu1 %v1547_v51 }
 0x1e1   : > { %899 = vmatprep.mubr.bf16.mxu0 %v1548_v52  ;;  %931 = vmatprep.mubr.bf16.mxu1 %v1550_v53 }
 0x1e8   : > { %900 = vmatmul.mubr.bf16.gmra.mrb[12].mxu0 %v1552_v54  ;;  %932 = vmatmul.mubr.bf16.gmra.mrb[12].mxu1 %v1553_v55 }
 0x2a3   : > { %v1254_v56 = vpop.f32.mrb[0].mxu0  ;;  %v1278_v57 = vpop.f32.mrb[0].mxu1 }
 0x2a4   : > { %v1255_v59 = vpop.f32.mrb[1].mxu0  ;;  %v1279_v60 = vpop.f32.mrb[1].mxu1 }
 0x2a5   : > { %v1256_v61 = vadd.f32 %v1255_v59, %v1254_v56  ;;  %v1280_v62 = vadd.f32 %v1279_v60, %v1278_v57  ;;  %v1257_v63 = vpop.f32.mrb[2].mxu0  ;;  %v1281_v0 = vpop.f32.mrb[2].mxu1 }
 0x2a6   : > { %v1258_v1 = vpop.f32.mrb[3].mxu0  ;;  %v1282_v2 = vpop.f32.mrb[3].mxu1 }
 0x2a7   : > { %v2126_v3 = vadd.f32 %v1256_v61, %v2123_v58  ;;  %v2129_v4 = vadd.f32 %v1280_v62, %v2123_v58  ;;  %v1259_v5 = vadd.f32 %v1258_v1, %v1257_v63  ;;  %v1283_v6 = vadd.f32 %v1282_v2, %v1281_v0 }
 0x2a9   : > { %v940_v7 = vmax.f32 %v2126_v3, 0.0  ;;  %v948_v8 = vmax.f32 %v2129_v4, 0.0  ;;  %v2134_v9 = vadd.f32 %v1259_v5, %v2123_v58  ;;  %v2137_v10 = vadd.f32 %v1283_v6, %v2123_v58 }
 0x2ab   : > { %v941_v11 = vmax.f32 %v2134_v9, 0.0  ;;  %v949_v12 = vmax.f32 %v2137_v10, 0.0  ;;  %v1260_v13 = vpop.f32.mrb[4].mxu0  ;;  %v1284_v14 = vpop.f32.mrb[4].mxu1 }
 0x2ac   : > { %v1261_v15 = vpop.f32.mrb[5].mxu0  ;;  %v1285_v16 = vpop.f32.mrb[5].mxu1 }
 0x2ad   : > { %v1262_v17 = vadd.f32 %v1261_v15, %v1260_v13  ;;  %v1286_v18 = vadd.f32 %v1285_v16, %v1284_v14  ;;  %v1263_v19 = vpop.f32.mrb[6].mxu0  ;;  %v1287_v20 = vpop.f32.mrb[6].mxu1 }
 0x2ae   : > { %v1264_v21 = vpop.f32.mrb[7].mxu0  ;;  %v1288_v22 = vpop.f32.mrb[7].mxu1 }
 0x2af   : > { %v2142_v23 = vadd.f32 %v1262_v17, %v2123_v58  ;;  %v2145_v24 = vadd.f32 %v1286_v18, %v2123_v58  ;;  %v1265_v25 = vadd.f32 %v1264_v21, %v1263_v19  ;;  %v1289_v26 = vadd.f32 %v1288_v22, %v1287_v20 }
 0x2b0   : > { %v961_v18 = vpack.c.bf16 (!%p1201_p1), %v941_v11, %v940_v7 }
 0x2b1   : > { %v942_v27 = vmax.f32 %v2142_v23, 0.0  ;;  %v950_v28 = vmax.f32 %v2145_v24, 0.0  ;;  %v2150_v29 = vadd.f32 %v1265_v25, %v2123_v58  ;;  %v2153_v30 = vadd.f32 %v1289_v26, %v2123_v58 }
 0x2b2   : > { %973 = vst [vmem:[%s972_s9] sm:$0xff] (!%p1201_p1), %v961_v18 }
 0x2b3   : > { %v943_v31 = vmax.f32 %v2150_v29, 0.0  ;;  %v951_v32 = vmax.f32 %v2153_v30, 0.0  ;;  %v1266_v33 = vpop.f32.mrb[8].mxu0  ;;  %v1290_v34 = vpop.f32.mrb[8].mxu1 }
 0x2b4   : > { %v1267_v35 = vpop.f32.mrb[9].mxu0  ;;  %v1291_v36 = vpop.f32.mrb[9].mxu1 }
 0x2b5   : > { %v1268_v37 = vadd.f32 %v1267_v35, %v1266_v33  ;;  %v1292_v38 = vadd.f32 %v1291_v36, %v1290_v34  ;;  %v1269_v39 = vpop.f32.mrb[10].mxu0  ;;  %v1293_v40 = vpop.f32.mrb[10].mxu1  ;;  %v962_v19 = vpack.c.bf16 (!%p1201_p1), %v943_v31, %v942_v27  ;;  %v966_v22 = vpack.c.bf16 (!%p1201_p1), %v951_v32, %v950_v28 }
 0x2b6   : > { %v1270_v41 = vpop.f32.mrb[11].mxu0  ;;  %v1294_v42 = vpop.f32.mrb[11].mxu1 }
 0x2b7   : > { %v894_v43 = vadd.f32 %v1268_v37, %v2123_v58  ;;  %v2159_v44 = vadd.f32 %v1292_v38, %v2123_v58  ;;  %v1271_v45 = vadd.f32 %v1270_v41, %v1269_v39  ;;  %v1295_v46 = vadd.f32 %v1294_v42, %v1293_v40  ;;  %974 = vst [vmem:[%s972_s9 + $0x8] sm:$0xff] (!%p1201_p1), %v962_v19 }
 0x2b8   : > { %978 = vst [vmem:[%s972_s9 + $0x28] sm:$0xff] (!%p1201_p1), %v966_v22 }
 0x2b9   : > { %v944_v47 = vmax.f32 %v894_v43, 0.0  ;;  %v952_v48 = vmax.f32 %v2159_v44, 0.0  ;;  %v897_v49 = vadd.f32 %v1271_v45, %v2123_v58  ;;  %v929_v50 = vadd.f32 %v1295_v46, %v2123_v58 }
 0x2bb   : > { %v945_v51 = vmax.f32 %v897_v49, 0.0  ;;  %v953_v52 = vmax.f32 %v929_v50, 0.0  ;;  %v1272_v53 = vpop.f32.mrb[12].mxu0  ;;  %v1296_v54 = vpop.f32.mrb[12].mxu1 }
 0x2bc   : > { %v1273_v55 = vpop.f32.mrb[13].mxu0  ;;  %v1297_v56 = vpop.f32.mrb[13].mxu1 }
 0x2bd   : > { %v1274_v57 = vadd.f32 %v1273_v55, %v1272_v53  ;;  %v1298_v59 = vadd.f32 %v1297_v56, %v1296_v54  ;;  %v1275_v60 = vpop.f32.mrb[14].mxu0  ;;  %v1299_v61 = vpop.f32.mrb[14].mxu1  ;;  %959 = sbr.rel (%p1201_p1) target bundleno = 712 (0x2c8), region = 60  ;;  %v963_v20 = vpack.c.bf16 (!%p1201_p1), %v945_v51, %v944_v47  ;;  %v967_v25 = vpack.c.bf16 (!%p1201_p1), %v953_v52, %v952_v48 }
 0x2be   : > { %v1276_v62 = vpop.f32.mrb[15].mxu0  ;;  %v1300_v63 = vpop.f32.mrb[15].mxu1 }
 0x2bf   : > { %v902_v0 = vadd.f32 %v1274_v57, %v2123_v58  ;;  %v934_v1 = vadd.f32 %v1298_v59, %v2123_v58  ;;  %v1277_v2 = vadd.f32 %v1276_v62, %v1275_v60  ;;  %v1301_v5 = vadd.f32 %v1300_v63, %v1299_v61  ;;  %975 = vst [vmem:[%s972_s9 + $0x10] sm:$0xff] (!%p1201_p1), %v963_v20 }
 0x2c0   : > { %979 = vst [vmem:[%s972_s9 + $0x30] sm:$0xff] (!%p1201_p1), %v967_v25 }
 0x2c1   : > { %v946_v6 = vmax.f32 %v902_v0, 0.0  ;;  %v954_v13 = vmax.f32 %v934_v1, 0.0  ;;  %v905_v14 = vadd.f32 %v1277_v2, %v2123_v58  ;;  %v937_v15 = vadd.f32 %v1301_v5, %v2123_v58 }
 0x2c2   : > { %v965_v58 = vpack.c.bf16 (!%p1201_p1), %v949_v12, %v948_v8 }
 0x2c3   : > { %v947_v16 = vmax.f32 %v905_v14, 0.0  ;;  %v955_v17 = vmax.f32 %v937_v15, 0.0 }
 0x2c4   : > { %977 = vst [vmem:[%s972_s9 + $0x20] sm:$0xff] %v965_v58 }
 0x2c5   : > { %v964_v21 = vpack.c.bf16 %v947_v16, %v946_v6  ;;  %v968_v26 = vpack.c.bf16 %v955_v17, %v954_v13 }
 0x2c7   : > { %976 = vst [vmem:[%s972_s9 + $0x18] sm:$0xff] %v964_v21  ;;  %980 = vst [vmem:[%s972_s9 + $0x38] sm:$0xff] %v968_v26 }
 0x2c8 PF: > { %p1204_p5 = scmp.ne.s32.totalorder %s1760_s22, 1 }
 0x2c9   : > { %985 = vst [vmem:[%s2091_s20] sm:$0xff] (!%p1204_p5), %v940_v7  ;;  %986 = vst [vmem:[%s2091_s20 + $0x8] sm:$0xff] (!%p1204_p5), %v941_v11 }
 0x2ca   : > { %984 = sbr.rel (%p1204_p5) target bundleno = 721 (0x2d1), region = 64  ;;  %987 = vst [vmem:[%s2091_s20 + $0x10] sm:$0xff] (!%p1204_p5), %v942_v27  ;;  %988 = vst [vmem:[%s2091_s20 + $0x18] sm:$0xff] (!%p1204_p5), %v943_v31 }
 0x2cb   : > { %989 = vst [vmem:[%s2091_s20 + $0x20] sm:$0xff] (!%p1204_p5), %v944_v47  ;;  %990 = vst [vmem:[%s2091_s20 + $0x28] sm:$0xff] (!%p1204_p5), %v945_v51 }
 0x2cc   : > { %991 = vst [vmem:[%s2091_s20 + $0x30] sm:$0xff] (!%p1204_p5), %v946_v6  ;;  %992 = vst [vmem:[%s2091_s20 + $0x38] sm:$0xff] (!%p1204_p5), %v947_v16 }
 0x2cd   : > { %993 = vst [vmem:[%s2091_s20 + $0x40] sm:$0xff] (!%p1204_p5), %v948_v8  ;;  %994 = vst [vmem:[%s2091_s20 + $0x48] sm:$0xff] (!%p1204_p5), %v949_v12 }
 0x2ce   : > { %995 = vst [vmem:[%s2091_s20 + $0x50] sm:$0xff] (!%p1204_p5), %v950_v28  ;;  %996 = vst [vmem:[%s2091_s20 + $0x58] sm:$0xff] (!%p1204_p5), %v951_v32 }
 0x2cf   : > { %997 = vst [vmem:[%s2091_s20 + $0x60] sm:$0xff] (!%p1204_p5), %v952_v48  ;;  %998 = vst [vmem:[%s2091_s20 + $0x68] sm:$0xff] (!%p1204_p5), %v953_v52 }
 0x2d0   : > { %999 = vst [vmem:[%s2091_s20 + $0x70] sm:$0xff] (!%p1204_p5), %v954_v13  ;;  %1000 = vst [vmem:[%s2091_s20 + $0x78] sm:$0xff] (!%p1204_p5), %v955_v17 }
 0x2d1 PF: > { %s1213_s22 = sshll.u32 %s1756_s21, 11  ;;  %s1015_s15 = sshll.u32 %s2091_s20, 4  ;;  %s2226_s15 = int_to_ptr.vmem [resolvable:$true] %s1015_s15 }
 0x2d2   : > { %s2223_s27 = scalar_lea.hbm %s2295_s4, %s1213_s22  ;;  %s2230_s1 = scalar_lea.sflag [#allocation6], %s248_s14 }
 0x2d3   : > { %s1642_s6 = scalar_lea.vmem %s2226_s15, 2048  ;;  %p2336_p4 = scmp.ne.s32.totalorder %s2322_s12, 0 }
 0x2d4   : > { %p1643_p12 = scmp.ne.s32.totalorder %s2226_s15, %s1642_s6  ;;  %s1781_s21 = smov [#allocation10]  }
 0x2d5   : > { %s1646_s10 = sshll.u32 %s1781_s21, 4  ;;  %s1647_s10 = int_to_ptr.vmem [resolvable:$false] %s1646_s10 }
 0x2d6   : > { %p1644_p10 = pnand %p1643_p12, %p2336_p4  ;;  %s1648_s23 = scalar_lea.vmem %s1647_s10, 4096 }
 0x2d7   : > { %p1649_p0 = scmp.lt.s32.totalorder %s2226_s15, %s1647_s10  ;;  %p1650_p8 = scmp.lt.s32.totalorder %s1648_s23, %s1642_s6 }
 0x2d8   : > { %p1645_p11 = pneg %p1644_p10 }
 0x2d9   : > { %p1651_p2 = por %p1650_p8, %p1649_p0 }
 0x2db   : > { %p1652_p3 = pnand %p1651_p2, %p1645_p11 }
 0x2dd   : > { %1655 = shalt.err (!%p1652_p3)
}
 0x2de   : > { %s1656_s14 = scalar_lea.hbm %s2223_s27, 2048  ;;  %s1660_s11 = scalar_lea.hbm %s2295_s4, 4096 }
 0x2df   : > { %p1657_p6 = scmp.ne.s32.totalorder %s2223_s27, %s1656_s14  ;;  %p1661_p13 = scmp.lt.u32.totalorder %s2223_s27, %s2295_s4 }
 0x2e0   : > { %p1662_p1 = scmp.lt.u32.totalorder %s1660_s11, %s1656_s14  ;;  %p1664_p12 = scmp.lt.u32.totalorder %s1656_s14, %s2223_s27 }
 0x2e1   : > { %p1658_p7 = pnand %p1657_p6, %p2336_p4 }
 0x2e2   : > { %p1663_p5 = por %p1662_p1, %p1661_p13 }
 0x2e3   : > { %p1659_p9 = pneg %p1658_p7 }
 0x2e4   : > { %p1665_p10 = por %p1664_p12, %p1663_p5 }
 0x2e6   : > { %p1666_p11 = pnand %p1665_p10, %p1659_p9 }
 0x2e8   : > { %1669 = shalt.err (!%p1666_p11)
}
 0x2e9   : > { %s1782_s8 = smov 128   ;;  %s1783_s7 = smov 8  }
 0x2ea   : > { %1390 = dma.vmem_to_hbm [thread:$0]  (%p2336_p4), %s2226_s15, 2048, %s2223_s27, %s2230_s1, %s1782_s8, %s1782_s8, %s1783_s7  }
 0x2eb PF: > { %s2337_s9 = sld [smem:[#allocation15_spill]]  ;;  %s2338_s22 = sld [smem:[#allocation20_spill]] }
 0x2ec   : > { %p1410_p0 = scmp.ge.s32.totalorder %s1772_s25, 2 }
 0x2f1   : > { %s1030_s28 = sand.u32 1, %s2337_s9   ;;  %p2339_p8 = scmp.ne.s32.totalorder %s2338_s22, 0 }
 0x2f2   : > { %s1031_s18 = scalar_lea.sflag [#allocation6], %s1030_s28 }
 0x2f3   : > { %p1404_p2 = pnand %p1410_p0, %p2339_p8 }
 0x2f5   : > { %1727 = dma.done.wait (!%p1404_p2), %s1031_s18, 2048  }
 0x2f6   : > { %1729 = vsyncadd (!%p1404_p2), %s1031_s18, 4294965248  ;;  %s21_s25 = sadd.s32 1, %s1772_s25   ;;  %s2340_s12 = sld [smem:[#allocation16_spill]] }
 0x2f7   : > { %p18_p3 = scmp.ge.s32.totalorder %s21_s25, 6   ;;  %s2341_s20 = sld [smem:[#allocation19_spill]] }
 0x2f8   : > { %s2342_s21 = sld [smem:[#allocation17_spill]]  ;;  %s2343_s23 = sld [smem:[#allocation18_spill]] }
 0x2f9   : > { %s2344_s15 = smov %s1736_s16  ;;  %s2345_s16 = smov %s1740_s17 }
 0x2fa   : > { %s2346_s17 = smov %s2027_s29  ;;  %s2347_s18 = smov %s1748_s19 }
 0x2fb   : > { %s2349_s22 = smov %s1768_s24  ;;  %s2350_s24 = smov %s2356_s26 }
 0x2fc   : > { %s2348_s19 = smov %s2340_s12  ;;  %20 = sbr.rel (!%p18_p3) target bundleno = 12 (0xc), region = 117 }
 0x303   :  { %1036 = vsyncpa [#allocation5], 1 }
 0x304   :  { %1038 = vsyncpa [#allocation5 + $0x1], 1 }
 0x305   :  { %1039 = vsyncpa [#allocation8], 1 }
 0x306   :  { %1041 = vsyncpa [#allocation8 + $0x1], 1 }
 0x307   :  { %1042 = vsyncpa [#allocation6], 1 }
 0x308   :  { %1044 = vsyncpa [#allocation6 + $0x1], 1 }

</bundles_post_ra>
